<compile_context>
chip_gen: v6e
topology: v6e:2x2x1
jax: 0.10.0
libtpu: 0.0.40
codegen_flags: <defaults>
</compile_context>

<pallas_src>
import functools
import math

import numpy as np
import jax
import jax.numpy as jnp
from jax.experimental import pallas as pl
from jax.experimental.pallas import tpu as pltpu


# ----------------------------------------------------------------------------
# Math helpers shared by the kernels and the pure-JAX reference.
# ----------------------------------------------------------------------------
def _gelu_tanh(x):
    # tanh-approx GELU: the tanh lowers to the EUP (its own bundle slot) instead of a
    # ~10-op VALU erf polynomial applied to the largest tensor in the kernel.
    # TODO(synk): PyTorch nn.GELU default is exact erf; the tanh approx differs by <~1e-3.
    c = 0.7978845608028654  # sqrt(2/pi)
    return 0.5 * x * (1.0 + jnp.tanh(c * (x + 0.044715 * x * x * x)))


def _layernorm(x, w, b, eps=1e-6):
    mu = jnp.mean(x, axis=-1, keepdims=True)
    xc = x - mu
    var = jnp.mean(xc * xc, axis=-1, keepdims=True)
    return xc * jax.lax.rsqrt(var + eps) * w + b


# ----------------------------------------------------------------------------
# Per-generation VMEM budgeting.
# ----------------------------------------------------------------------------
@functools.lru_cache(maxsize=None)
def _vmem_capacity_bytes():
    try:
        cap = int(pltpu.get_tpu_info().vmem_capacity_bytes)
        if cap > 0:
            return cap
    except Exception:
        pass
    return 64 * 1024 * 1024  # conservative default (v7x per-TensorCore VMEM)


def _vmem_budget_bytes():
    # Sizing target for tiles (leave headroom for compiler scratch / pipelining).
    return int(_vmem_capacity_bytes() * 0.70)


def _vmem_limit_bytes():
    # Explicit scoped-VMEM limit: the default scoped limit is only 16/32 MiB
    # (v5e / v6e+v7x), far below physical VMEM on v5e/v6e.
    return int(_vmem_capacity_bytes() * 0.85)


# ----------------------------------------------------------------------------
# Pallas kernel: predictor_embed (linear + positional add), row-tiled.
# ----------------------------------------------------------------------------
def _embed_kernel(x_ref, w_ref, b_ref, pos_ref, o_ref):
    # y = x @ W + b + pos  (bf16 MXU matmul, f32 accumulation / epilogue)
    o_ref[...] = (
        jnp.dot(x_ref[...].astype(jnp.bfloat16), w_ref[...],
                preferred_element_type=jnp.float32)
        + b_ref[...]
        + pos_ref[...]
    )


def embed_pallas(x2d, w, b, pos2d, tm_max=1024):
    m, d_in = x2d.shape
    d_out = w.shape[1]
    tm = m if m <= tm_max else tm_max
    return pl.pallas_call(
        _embed_kernel,
        out_shape=jax.ShapeDtypeStruct((m, d_out), jnp.float32),
        grid=(pl.cdiv(m, tm),),
        in_specs=[
            pl.BlockSpec((tm, d_in), lambda i: (i, 0)),
            pl.BlockSpec((d_in, d_out), lambda i: (0, 0)),
            pl.BlockSpec((1, d_out), lambda i: (0, 0)),
            pl.BlockSpec((tm, d_out), lambda i: (i, 0)),
        ],
        out_specs=pl.BlockSpec((tm, d_out), lambda i: (i, 0)),
        compiler_params=pltpu.CompilerParams(
            dimension_semantics=("parallel",),
            vmem_limit_bytes=_vmem_limit_bytes()),
    )(x2d, w, b, pos2d)


# ----------------------------------------------------------------------------
# Fused transformer stack + predictor_norm + predictor_proj: one pallas_call.
# ----------------------------------------------------------------------------
def _stack_vmem_bytes(bt, s, d, hidden, s_pred, d_ctx):
    """Rough VMEM usage estimate for one grid step of the fused stack kernel."""
    rows = bt * s
    w_layer = 2 * (3 * d * d + d * d + 2 * d * hidden)      # bf16 matmul weights / layer
    w_layer += 4 * (7 * d + 3 * d + hidden)                  # LN params + biases (f32)
    weights = 2 * w_layer                                    # double-buffered weight stream
    final = 2 * (2 * d * d_ctx + 4 * (2 * d + d_ctx))        # predictor_norm / proj params
    x_in = 2 * rows * d * 4                                  # double-buffered input block
    act = rows * d * 4                                       # resident activation scratch
    pred = 2 * bt * s_pred * d_ctx * 4                       # double-buffered output block
    inter = rows * (3 * d + hidden + 2 * d) * 4 + bt * s * s * 8   # qkv / mlp / score temps
    return weights + final + x_in + act + pred + inter


def _pick_batch_tile(n, s, d, hidden, s_pred, d_ctx, budget, max_rows=2048):
    """Largest divisor bt of n whose estimated VMEM footprint fits the budget.

    Capped at n // 2 (when possible) so the 'parallel' batch axis has >= 2 tiles and
    both TensorCores of a v7x chip get work; v5e/v6e are single-TC so the cap is cheap.
    """
    if s % 8 != 0:
        # TODO(synk): pad seq to a multiple of 8 in the wrapper instead of degrading bt.
        return 1
    cap = n // 2 if n >= 2 else n
    best = 1
    for bt in range(1, cap + 1):
        if n % bt != 0:
            continue
        if bt * s > max_rows:
            continue
        if _stack_vmem_bytes(bt, s, d, hidden, s_pred, d_ctx) > budget:
            continue
        best = bt
    return best


def vit_stack_predict_pallas(x, lw, norm_w, norm_b, proj_w, proj_b, num_heads, boundary):
    """All ViT layers (x + MHSA(LN(x)); x + MLP(LN(x))) + final norm/proj in one call.

    x:  [n, s, d] f32 (embedded context ++ prediction tokens)
    lw: depth-stacked per-layer weights (matmul weights bf16, LN/bias f32):
        ln1_w/ln1_b/ln2_w/ln2_b/b_proj/b_fc2: [L, 1, d]
        w_qkv: [L, d, 3d], b_qkv: [L, 1, 3d], w_proj: [L, d, d]
        w_fc1: [L, d, hidden], b_fc1: [L, 1, hidden], w_fc2: [L, hidden, d]
    Returns [n, s - boundary, d_ctx] f32 (projected prediction tokens only).
    """
    n, s, d = x.shape
    depth = lw["w_qkv"].shape[0]
    hidden = lw["w_fc1"].shape[2]
    d_ctx = proj_w.shape[1]
    s_pred = s - boundary
    assert d % num_heads == 0
    dh = d // num_heads
    scale = dh ** -0.5
    bf16 = jnp.bfloat16

    bt = _pick_batch_tile(n, s, d, hidden, s_pred, d_ctx, _vmem_budget_bytes())
    rows = bt * s

    def kernel(x_ref, ln1w_ref, ln1b_ref, wqkv_ref, bqkv_ref, wproj_ref, bproj_ref,
               ln2w_ref, ln2b_ref, wfc1_ref, bfc1_ref, wfc2_ref, bfc2_ref,
               nw_ref, nbias_ref, pw_ref, pb_ref, pred_ref, act_ref):
        layer = pl.program_id(1)

        # Activation stays resident in a VMEM scratch across the 'arbitrary' depth axis;
        # seed it from the HBM input block on the first layer of each batch tile.
        @pl.when(layer == 0)
        def _():
            act_ref[...] = x_ref[...].reshape(rows, d)

        xf = act_ref[...]                                              # [rows, d] f32

        # ---------------- attention branch ----------------
        h = _layernorm(xf, ln1w_ref[0], ln1b_ref[0]).astype(bf16)
        qkv = (jnp.dot(h, wqkv_ref[0], preferred_element_type=jnp.float32)
               + bqkv_ref[0])                                          # [rows, 3d] f32
        qkv3 = qkv.reshape(bt, s, 3 * d)

        # Per-head attention batched over the bt sequences.  The output projection is
        # folded into the head loop via sublane-aligned row slices of w_proj, so there
        # are no 32-lane masked stores or lane-axis concatenates of head outputs.
        attn = jnp.zeros((rows, d), jnp.float32)
        for hd in range(num_heads):
            q = qkv3[:, :, hd * dh:(hd + 1) * dh].astype(bf16)                 # [bt,s,dh]
            k = qkv3[:, :, d + hd * dh:d + (hd + 1) * dh].astype(bf16)
            v = qkv3[:, :, 2 * d + hd * dh:2 * d + (hd + 1) * dh].astype(bf16)
            sc = jnp.einsum("bqd,bkd->bqk", q, k,
                            preferred_element_type=jnp.float32) * scale
            mx = jnp.max(sc, axis=-1, keepdims=True)
            e = jnp.exp(sc - mx)
            p = (e * pl.reciprocal(jnp.sum(e, axis=-1, keepdims=True),
                                   approx=True)).astype(bf16)
            oh = jnp.einsum("bqk,bkd->bqd", p, v,
                            preferred_element_type=jnp.float32)                # [bt,s,dh]
            attn = attn + jnp.dot(oh.reshape(rows, dh).astype(bf16),
                                  wproj_ref[0, hd * dh:(hd + 1) * dh, :],
                                  preferred_element_type=jnp.float32)
        x1 = xf + attn + bproj_ref[0]

        # ---------------- MLP branch ----------------
        h2 = _layernorm(x1, ln2w_ref[0], ln2b_ref[0]).astype(bf16)
        h2 = jnp.dot(h2, wfc1_ref[0], preferred_element_type=jnp.float32) + bfc1_ref[0]
        h2 = _gelu_tanh(h2).astype(bf16)
        h2 = jnp.dot(h2, wfc2_ref[0], preferred_element_type=jnp.float32) + bfc2_ref[0]
        xnew = x1 + h2
        act_ref[...] = xnew

        # ---------------- final norm + proj epilogue (last layer only) ----------------
        @pl.when(layer == depth - 1)
        def _():
            xp = xnew.reshape(bt, s, d)[:, boundary:, :].reshape(bt * s_pred, d)
            hp = _layernorm(xp, nw_ref[...], nbias_ref[...], eps=1e-6).astype(bf16)
            out = (jnp.dot(hp, pw_ref[...], preferred_element_type=jnp.float32)
                   + pb_ref[...])
            pred_ref[...] = out.reshape(bt, s_pred, d_ctx)

    wmap = lambda nb, l: (l, 0, 0)     # stream per-layer weights along the depth axis
    xmap = lambda nb, l: (nb, 0, 0)    # activation input / prediction output (per tile)
    cmap = lambda nb, l: (0, 0)        # final norm / proj params (constant)

    in_specs = [
        pl.BlockSpec((bt, s, d), xmap),
        pl.BlockSpec((1, 1, d), wmap),             # ln1_w
        pl.BlockSpec((1, 1, d), wmap),             # ln1_b
        pl.BlockSpec((1, d, 3 * d), wmap),         # w_qkv (bf16)
        pl.BlockSpec((1, 1, 3 * d), wmap),         # b_qkv
        pl.BlockSpec((1, d, d), wmap),             # w_proj (bf16)
        pl.BlockSpec((1, 1, d), wmap),             # b_proj
        pl.BlockSpec((1, 1, d), wmap),             # ln2_w
        pl.BlockSpec((1, 1, d), wmap),             # ln2_b
        pl.BlockSpec((1, d, hidden), wmap),        # w_fc1 (bf16)
        pl.BlockSpec((1, 1, hidden), wmap),        # b_fc1
        pl.BlockSpec((1, hidden, d), wmap),        # w_fc2 (bf16)
        pl.BlockSpec((1, 1, d), wmap),             # b_fc2
        pl.BlockSpec((1, d), cmap),                # predictor_norm weight
        pl.BlockSpec((1, d), cmap),                # predictor_norm bias
        pl.BlockSpec((d, d_ctx), cmap),            # predictor_proj weight (bf16)
        pl.BlockSpec((1, d_ctx), cmap),            # predictor_proj bias
    ]

    # TODO(synk): for very small predictors, hold ALL layer weights resident in VMEM and
    # loop depth with lax.fori_loop inside the kernel to avoid re-streaming them per tile.
    return pl.pallas_call(
        kernel,
        out_shape=jax.ShapeDtypeStruct((n, s_pred, d_ctx), jnp.float32),
        grid=(n // bt, depth),
        in_specs=in_specs,
        out_specs=pl.BlockSpec((bt, s_pred, d_ctx), xmap),
        scratch_shapes=[pltpu.VMEM((rows, d), jnp.float32)],
        compiler_params=pltpu.CompilerParams(
            dimension_semantics=("parallel", "arbitrary"),
            vmem_limit_bytes=_vmem_limit_bytes()),
    )(x, lw["ln1_w"], lw["ln1_b"], lw["w_qkv"], lw["b_qkv"],
      lw["w_proj"], lw["b_proj"], lw["ln2_w"], lw["ln2_b"],
      lw["w_fc1"], lw["b_fc1"], lw["w_fc2"], lw["b_fc2"],
      norm_w, norm_b, proj_w, proj_b)


# ----------------------------------------------------------------------------
# Pure-JAX glue mirroring the PyTorch helper functions.
# ----------------------------------------------------------------------------
def select_patches_by_indices(x, patch_selections):
    outs = []
    for sel in patch_selections:
        idx = jnp.broadcast_to(sel[..., None], sel.shape + (x.shape[-1],))
        outs.append(jnp.take_along_axis(x, idx, axis=1))
    return jnp.concatenate(outs, axis=0)


def repeat_patches_along_with_batch_axis(x, batch_size, n_patch_selections_for_context_encoder):
    n_pred = x.shape[0] // batch_size
    out = []
    for i in range(n_pred):
        chunk = x[i * batch_size:(i + 1) * batch_size]
        out.append(jnp.concatenate(
            [chunk] * n_patch_selections_for_context_encoder, axis=0))
    return jnp.concatenate(out, axis=0)


def get_2d_positional_embeddings(embed_dim, grid_size):
    # Standard MAE/I-JEPA 2D sin-cos positional embedding.
    def get_1d(dim, pos):
        omega = np.arange(dim // 2, dtype=np.float64) / (dim / 2.0)
        omega = 1.0 / 10000 ** omega
        pos = pos.reshape(-1)
        out = np.einsum("m,d->md", pos, omega)
        return np.concatenate([np.sin(out), np.cos(out)], axis=1)

    gh, gw = grid_size
    grid_h = np.arange(gh, dtype=np.float64)
    grid_w = np.arange(gw, dtype=np.float64)
    grid = np.meshgrid(grid_w, grid_h)
    grid = np.stack(grid, axis=0).reshape([2, 1, gh, gw])
    emb_h = get_1d(embed_dim // 2, grid[0])
    emb_w = get_1d(embed_dim // 2, grid[1])
    return np.concatenate([emb_h, emb_w], axis=1)  # [gh*gw, embed_dim]


# ----------------------------------------------------------------------------
# Deterministic parameter initialization (mirrors __init__ + _init_weights +
# fix_init_weight; weights stored transposed as [in, out]; matmul weights bf16;
# transformer layers depth-stacked so the fused kernel can stream them).
# ----------------------------------------------------------------------------
def _trunc(key, shape, std):
    return jax.random.truncated_normal(key, -2.0, 2.0, shape, jnp.float32) * std


def init_params(key, d_ctx, d_pred, depth, mlp_ratio, grid_size, init_std=0.02):
    hidden = int(d_pred * mlp_ratio)
    keys = jax.random.split(key, 3 + depth)
    wdt = jnp.bfloat16   # matmul weights consumed by the MXU in bf16
    params = {
        "embed_w": _trunc(keys[0], (d_ctx, d_pred), init_std).astype(wdt),
        "embed_b": jnp.zeros((1, d_pred), jnp.float32),
        "token": _trunc(keys[1], (1, 1, d_pred), init_std),
        "pos": jnp.asarray(
            get_2d_positional_embeddings(d_pred, grid_size).reshape(
                1, grid_size[0] * grid_size[1], d_pred),
            jnp.float32),
        "norm_w": jnp.ones((1, d_pred), jnp.float32),
        "norm_b": jnp.zeros((1, d_pred), jnp.float32),
        "proj_w": _trunc(keys[2], (d_pred, d_ctx), init_std).astype(wdt),
        "proj_b": jnp.zeros((1, d_ctx), jnp.float32),
    }
    layer_list = []
    for i in range(depth):
        lk = jax.random.split(keys[3 + i], 4)
        rescale = 1.0 / math.sqrt(2.0 * (i + 1))  # fix_init_weight
        layer_list.append(dict(
            ln1_w=jnp.ones((1, d_pred), jnp.float32),
            ln1_b=jnp.zeros((1, d_pred), jnp.float32),
            w_qkv=_trunc(lk[0], (d_pred, 3 * d_pred), init_std).astype(wdt),
            b_qkv=jnp.zeros((1, 3 * d_pred), jnp.float32),
            w_proj=(_trunc(lk[1], (d_pred, d_pred), init_std) * rescale).astype(wdt),
            b_proj=jnp.zeros((1, d_pred), jnp.float32),
            ln2_w=jnp.ones((1, d_pred), jnp.float32),
            ln2_b=jnp.zeros((1, d_pred), jnp.float32),
            w_fc1=_trunc(lk[2], (d_pred, hidden), init_std).astype(wdt),
            b_fc1=jnp.zeros((1, hidden), jnp.float32),
            w_fc2=(_trunc(lk[3], (hidden, d_pred), init_std) * rescale).astype(wdt),
            b_fc2=jnp.zeros((1, d_pred), jnp.float32),
        ))
    params["layers"] = {k: jnp.stack([lp[k] for lp in layer_list], axis=0)
                        for k in layer_list[0]}
    return params


# ----------------------------------------------------------------------------
# Forward pass (Pallas) and a pure-JAX f32 reference for the sanity check.
# ----------------------------------------------------------------------------
def _ref_vit_block(x, lp, num_heads):
    n, s, d = x.shape
    dh = d // num_heads
    scale = dh ** -0.5
    h = _layernorm(x, lp["ln1_w"], lp["ln1_b"])
    qkv = h @ lp["w_qkv"] + lp["b_qkv"]
    q = qkv[..., :d].reshape(n, s, num_heads, dh).transpose(0, 2, 1, 3)
    k = qkv[..., d:2 * d].reshape(n, s, num_heads, dh).transpose(0, 2, 1, 3)
    v = qkv[..., 2 * d:].reshape(n, s, num_heads, dh).transpose(0, 2, 1, 3)
    sc = jnp.einsum("nhqd,nhkd->nhqk", q, k) * scale
    p = jax.nn.softmax(sc, axis=-1)
    o = jnp.einsum("nhqk,nhkd->nhqd", p, v).transpose(0, 2, 1, 3).reshape(n, s, d)
    x = x + o @ lp["w_proj"] + lp["b_proj"]
    h2 = _layernorm(x, lp["ln2_w"], lp["ln2_b"])
    h2 = _gelu_tanh(h2 @ lp["w_fc1"] + lp["b_fc1"])
    return x + h2 @ lp["w_fc2"] + lp["b_fc2"]


def ijepa_predictor_forward(params, latents, ctx_sels, pred_sels, num_heads,
                            use_pallas=True):
    n_ctx_sel = len(ctx_sels)
    n_pred_sel = len(pred_sels)
    assert latents.shape[0] % n_ctx_sel == 0
    batch_size = latents.shape[0] // n_ctx_sel
    d_pred = params["embed_w"].shape[1]

    pos_b = jnp.tile(params["pos"], (batch_size, 1, 1))            # [B, P, Dp]
    pos_ctx = select_patches_by_indices(pos_b, ctx_sels)           # [B*nctx, Sctx, Dp]

    m, s_ctx, _ = latents.shape
    if use_pallas:
        x = embed_pallas(latents.reshape(m * s_ctx, -1),
                         params["embed_w"], params["embed_b"],
                         pos_ctx.reshape(m * s_ctx, d_pred))
        x = x.reshape(m, s_ctx, d_pred)
    else:
        x = (latents @ params["embed_w"].astype(jnp.float32)
             + params["embed_b"] + pos_ctx)

    boundary = s_ctx

    pos_pred = select_patches_by_indices(pos_b, pred_sels)         # [B*npred, Spred, Dp]
    pos_pred = repeat_patches_along_with_batch_axis(pos_pred, batch_size, n_ctx_sel)
    tokens = params["token"] + pos_pred                            # [B*nctx*npred, Spred, Dp]

    x = jnp.tile(x, (n_pred_sel, 1, 1))
    x = jnp.concatenate([x, tokens], axis=1)                        # [N, S, Dp]

    if use_pallas:
        # TODO(synk): the embed stage could also be fused into the layer-0 path of the
        # stack kernel to drop one more activation HBM round trip.
        return vit_stack_predict_pallas(
            x, params["layers"], params["norm_w"], params["norm_b"],
            params["proj_w"], params["proj_b"], num_heads, boundary)

    depth = params["layers"]["w_qkv"].shape[0]
    for i in range(depth):
        lp = {k: v[i].astype(jnp.float32) for k, v in params["layers"].items()}
        x = _ref_vit_block(x, lp, num_heads)
    h = _layernorm(x, params["norm_w"], params["norm_b"], eps=1e-6)
    h = h[:, boundary:]
    return h @ params["proj_w"].astype(jnp.float32) + params["proj_b"]


# ----------------------------------------------------------------------------
if __name__ == "__main__":
    key = jax.random.PRNGKey(0)

    # Small, forward-consistent, lane-aligned shapes (d multiple of 128, fused seq mult of 8).
    batch_size = 2
    grid_size = (4, 4)                      # 16 total patches
    n_patches_total = grid_size[0] * grid_size[1]
    context_encoder_embed_dim = 128
    predictor_embed_dim = 128
    depth = 2
    num_heads = 4                           # head_dim = 32
    mlp_ratio = 4.0
    n_ctx_sel, n_ctx_patches = 2, 6
    n_pred_sel, n_pred_patches = 2, 2       # fused seq = 6 + 2 = 8

    k_par, k_lat, k_sel = jax.random.split(key, 3)
    params = init_params(k_par, context_encoder_embed_dim, predictor_embed_dim,
                         depth, mlp_ratio, grid_size, init_std=0.02)

    latents = jax.random.normal(
        k_lat, (batch_size * n_ctx_sel, n_ctx_patches, context_encoder_embed_dim),
        jnp.float32)
    sel_keys = jax.random.split(k_sel, n_ctx_sel + n_pred_sel)
    ctx_sels = [jax.random.randint(sel_keys[i], (batch_size, n_ctx_patches),
                                   0, n_patches_total, jnp.int32)
                for i in range(n_ctx_sel)]
    pred_sels = [jax.random.randint(sel_keys[n_ctx_sel + i],
                                    (batch_size, n_pred_patches),
                                    0, n_patches_total, jnp.int32)
                 for i in range(n_pred_sel)]

    out = ijepa_predictor_forward(params, latents, ctx_sels, pred_sels,
                                  num_heads=num_heads, use_pallas=True)
    out = jax.block_until_ready(out)

    ref = ijepa_predictor_forward(params, latents, ctx_sels, pred_sels,
                                  num_heads=num_heads, use_pallas=False)
    ref = jax.block_until_ready(ref)

    expected_shape = (batch_size * n_ctx_sel * n_pred_sel, n_pred_patches,
                      context_encoder_embed_dim)
    assert out.shape == expected_shape, out.shape
    assert bool(jnp.isfinite(out).all())
    max_err = float(jnp.max(jnp.abs(out - ref)))
    assert bool(jnp.allclose(out, ref, atol=2e-2, rtol=2e-2)), max_err
    print("KERNEL_OK")
</pallas_src>

<mosaic_0001>
module attributes {stable_mosaic.version = 11 : i64} {
  func.func @_embed_kernel(%arg0: i32, %arg1: memref<24x128xf32, #tpu.memory_space<vmem>>, %arg2: memref<128x128xbf16, #tpu.memory_space<vmem>>, %arg3: memref<1x128xf32, #tpu.memory_space<vmem>>, %arg4: memref<24x128xf32, #tpu.memory_space<vmem>>, %arg5: memref<24x128xf32, #tpu.memory_space<vmem>>) attributes {dimension_semantics = [#tpu.dimension_semantics<parallel>], iteration_bounds = array<i64: 1>, scalar_prefetch = 0 : i64, scratch_operands = 0 : i64, tpu.core_type = #tpu.core_type<tc>, window_params = [{transform_indices = @transform_0, window_bounds = array<i64: 24, 128>}, {pipeline_mode = #tpu.pipeline_mode<synchronous>, transform_indices = @transform_1, window_bounds = array<i64: 128, 128>}, {pipeline_mode = #tpu.pipeline_mode<synchronous>, transform_indices = @transform_2, window_bounds = array<i64: 1, 128>}, {transform_indices = @transform_3, window_bounds = array<i64: 24, 128>}, {transform_indices = @transform_4, window_bounds = array<i64: 24, 128>}]} {
    %c0 = arith.constant 0 : index
    %c0_0 = arith.constant 0 : index
    %0 = vector.load %arg1[%c0, %c0_0] : memref<24x128xf32, #tpu.memory_space<vmem>>, vector<24x128xf32>
    %1 = arith.truncf %0 : vector<24x128xf32> to vector<24x128xbf16>
    %c0_1 = arith.constant 0 : index
    %c0_2 = arith.constant 0 : index
    %2 = vector.load %arg2[%c0_1, %c0_2] : memref<128x128xbf16, #tpu.memory_space<vmem>>, vector<128x128xbf16>
    %cst = arith.constant dense<0.000000e+00> : vector<24x128xf32>
    %3 = tpu.matmul %1, %2, %cst {dimension_numbers = #tpu.dot_dimension_numbers<[1], [0], [0], [1], [0, 0, 1, 1], [], []>} : vector<24x128xbf16>, vector<128x128xbf16>, vector<24x128xf32> -> vector<24x128xf32>
    %c0_3 = arith.constant 0 : index
    %c0_4 = arith.constant 0 : index
    %4 = vector.load %arg3[%c0_3, %c0_4] : memref<1x128xf32, #tpu.memory_space<vmem>>, vector<1x128xf32>
    %5 = vector.broadcast %4 : vector<1x128xf32> to vector<24x128xf32>
    %6 = arith.addf %3, %5 : vector<24x128xf32>
    %c0_5 = arith.constant 0 : index
    %c0_6 = arith.constant 0 : index
    %7 = vector.load %arg4[%c0_5, %c0_6] : memref<24x128xf32, #tpu.memory_space<vmem>>, vector<24x128xf32>
    %8 = arith.addf %6, %7 : vector<24x128xf32>
    %c0_7 = arith.constant 0 : index
    %c0_8 = arith.constant 0 : index
    %9 = vector.load %arg5[%c0_7, %c0_8] : memref<24x128xf32, #tpu.memory_space<vmem>>, vector<24x128xf32>
    tpu.vector_store %arg5[%c0_7, %c0_8], %8 {strides = array<i32>} : memref<24x128xf32, #tpu.memory_space<vmem>>, vector<24x128xf32>,
    return
  }
  func.func @transform_0(%arg0: i32) -> (i32, i32) {
    %c0_i32 = arith.constant 0 : i32
    %c0_i32_0 = arith.constant 0 : i32
    return %arg0, %c0_i32 : i32, i32
  }
  func.func @transform_1(%arg0: i32) -> (i32, i32) {
    %c0_i32 = arith.constant 0 : i32
    %c0_i32_0 = arith.constant 0 : i32
    %c0_i32_1 = arith.constant 0 : i32
    return %c0_i32, %c0_i32_0 : i32, i32
  }
  func.func @transform_2(%arg0: i32) -> (i32, i32) {
    %c0_i32 = arith.constant 0 : i32
    %c0_i32_0 = arith.constant 0 : i32
    %c0_i32_1 = arith.constant 0 : i32
    return %c0_i32, %c0_i32_0 : i32, i32
  }
  func.func @transform_3(%arg0: i32) -> (i32, i32) {
    %c0_i32 = arith.constant 0 : i32
    %c0_i32_0 = arith.constant 0 : i32
    return %arg0, %c0_i32 : i32, i32
  }
  func.func @transform_4(%arg0: i32) -> (i32, i32) {
    %c0_i32 = arith.constant 0 : i32
    %c0_i32_0 = arith.constant 0 : i32
    return %arg0, %c0_i32 : i32, i32
  }
}

</mosaic_0001>

<bundles_post_ra>
// kernel: tpu_custom_call.1
= control target key start
LH: loop header
LB: loop body
LE: loop exit
PB: predicated region body
PF: predicated region fallthrough
CT: control target
= control target key end

     0   :  { %9 = vsyncpa [#allocation3], 0  ;;  %s409_s0 = inlined_call_operand.hbm [shape: f32[24,128], index: 0, kind: input, shape index: {}]   ;;  %s410_s1 = inlined_call_operand.hbm [shape: bf16[128,128], index: 1, kind: input, shape index: {}]   ;;  %s411_s2 = inlined_call_operand.vmem [shape: f32[1,128], index: 2, kind: input, shape index: {}]   ;;  %s412_s3 = inlined_call_operand.hbm [shape: f32[24,128], index: 3, kind: input, shape index: {}]   ;;  %s413_s4 = inlined_call_operand.hbm [shape: f32[24,128], index: 4, kind: output, shape index: {}]  }
   0x1   :  { %10 = vsyncpa [#allocation6], 0 }
   0x2   :  { %11 = vsyncpa [#allocation4], 0  ;;  %s352_s15 = smov [#allocation5]  }
   0x3   :  { %s29_s16 = sshll.u32 %s352_s15, 4  ;;  %s30_s16 = int_to_ptr.vmem [resolvable:$true] %s29_s16 }
   0x4   :  { %s274_s17 = scalar_lea.vmem %s30_s16, 1024  ;;  %p279_p1 = scmp.lt.s32.totalorder %s30_s16, %s30_s16 }
   0x5   :  { %p275_p0 = scmp.ne.s32.totalorder %s30_s16, %s274_s17  ;;  %p280_p2 = scmp.lt.s32.totalorder %s274_s17, %s274_s17 }
   0x7   :  { %p281_p3 = por %p280_p2, %p279_p1 }
   0x9   :  { %p282_p4 = pnand %p281_p3, %p275_p0 }
   0xb   :  { %285 = shalt.err (!%p282_p4)
}
   0xc   :  { %s353_s18 = smov 64   ;;  %s354_s19 = smov 4  }
   0xd   :  { %35 = dma.hbm_to_vmem [thread:$0]  %s410_s1, 1024, %s30_s16, [#allocation6], %s353_s18, %s353_s18, %s354_s19  }
   0xe   :  { %s355_s22 = smov [#allocation2]  }
   0xf   :  { %s17_s23 = sshll.u32 %s355_s22, 4  ;;  %s18_s23 = int_to_ptr.vmem [resolvable:$true] %s17_s23 }
  0x10   :  { %s294_s24 = scalar_lea.vmem %s18_s23, 384  ;;  %p299_p6 = scmp.lt.s32.totalorder %s18_s23, %s18_s23 }
  0x11   :  { %p295_p5 = scmp.ne.s32.totalorder %s18_s23, %s294_s24  ;;  %p300_p7 = scmp.lt.s32.totalorder %s294_s24, %s294_s24 }
  0x13   :  { %p301_p8 = por %p300_p7, %p299_p6 }
  0x15   :  { %p302_p9 = pnand %p301_p8, %p295_p5 }
  0x17   :  { %305 = shalt.err (!%p302_p9)
}
  0x18   :  { %s356_s25 = smov 128   ;;  %s357_s26 = smov 8  }
  0x19   :  { %23 = dma.hbm_to_vmem [thread:$0]  %s409_s0, 384, %s18_s23, [#allocation3], %s356_s25, %s356_s25, %s357_s26  }
  0x1a   :  { %s358_s1 = smov [#allocation7]  }
  0x1b   :  { %s43_s29 = sshll.u32 %s358_s1, 4  ;;  %s44_s29 = int_to_ptr.vmem [resolvable:$true] %s43_s29 }
  0x1c   :  { %s314_s30 = scalar_lea.vmem %s44_s29, 384  ;;  %p319_p11 = scmp.lt.s32.totalorder %s44_s29, %s44_s29 }
  0x1d   :  { %p315_p10 = scmp.ne.s32.totalorder %s44_s29, %s314_s30  ;;  %p320_p12 = scmp.lt.s32.totalorder %s314_s30, %s314_s30 }
  0x1f   :  { %p321_p13 = por %p320_p12, %p319_p11 }
  0x21   :  { %p322_p0 = pnand %p321_p13, %p315_p10 }
  0x23   :  { %325 = shalt.err (!%p322_p0)
}
  0x24   :  { %49 = dma.hbm_to_vmem [thread:$0]  %s412_s3, 384, %s44_s29, [#allocation6], %s356_s25, %s356_s25, %s357_s26  }
  0x25   :  { %346 = dma.done.wait [#allocation3], 384  }
  0x26   :  { %347 = vsyncadd [#allocation3], 4294966912 }
  0x27   :  { %348 = dma.done.wait [#allocation6], 1408  }
  0x28   :  { %349 = vsyncadd [#allocation6], 4294965888  ;;  %v258_v0 = vld [vmem:[#allocation5 + $0x38] sm:$0xff]   ;;  %v259_v1 = vld [vmem:[#allocation5 + $0x30] sm:$0xff]   ;;  %s359_s7 = smov [#allocation8]  }
  0x29   :  { %230 = vmatprep.subr.bf16.mxu0 %v258_v0  ;;  %v260_v2 = vld [vmem:[#allocation5 + $0x28] sm:$0xff]   ;;  %v261_v3 = vld [vmem:[#allocation5 + $0x20] sm:$0xff]   ;;  %v61_v5 = vld [vmem:[#allocation2 + $0x8] sm:$0xff]  ;;  %s198_s8 = sshll.u32 %s359_s7, 4  ;;  %s199_s8 = int_to_ptr.vmem [resolvable:$true] %s198_s8 }
  0x2a   :  { %231 = vmatpush3.bf16.msra.mxu0 %v258_v0  ;;  %v60_v4 = vld [vmem:[#allocation2] sm:$0xff]  ;;  %v262_v7 = vld [vmem:[#allocation5 + $0x18] sm:$0xff]   ;;  %v263_v8 = vld [vmem:[#allocation5 + $0x10] sm:$0xff]   ;;  %p331_p2 = scmp.lt.s32.totalorder %s199_s8, %s199_s8 }
  0x2b   :  { %232 = vmatprep.subr.bf16.mxu0 %v259_v1  ;;  %v63_v6 = vpack.c.bf16 %v61_v5, %v60_v4  ;;  %v264_v9 = vld [vmem:[#allocation5 + $0x8] sm:$0xff]   ;;  %v265_v10 = vld [vmem:[#allocation5] sm:$0xff]   ;;  %v62_v11 = vld [vmem:[#allocation2 + $0x10] sm:$0xff] }
  0x2c   :  { %v64_v12 = vpack.c.bf16 %v62_v11, %v62_v11  ;;  %v211_v13 = vld [vmem:[%s411_s2] ss:$0 sm:$0xff]  ;;  %v186_v15 = vld [vmem:[#allocation7 + $0x10] sm:$0xff]  ;;  %v184_v18 = vld [vmem:[#allocation7] sm:$0xff]  ;;  %s326_s2 = scalar_lea.vmem %s199_s8, 384 }
  0x2d   :  { %246 = vmatprep.mubr.bf16.mxu0 %v63_v6  ;;  %v185_v24 = vld [vmem:[#allocation7 + $0x8] sm:$0xff]  ;;  %p327_p1 = scmp.ne.s32.totalorder %s199_s8, %s326_s2  ;;  %p332_p3 = scmp.lt.s32.totalorder %s326_s2, %s326_s2 }
  0x2e   :  { %233 = vmatpush3.bf16.msra.mxu0 %v259_v1 }
  0x2f   :  { %234 = vmatprep.subr.bf16.mxu0 %v260_v2  ;;  %p333_p4 = por %p332_p3, %p331_p2 }
  0x31   :  { %p334_p5 = pnand %p333_p4, %p327_p1 }
  0x32   :  { %235 = vmatpush3.bf16.msra.mxu0 %v260_v2 }
  0x33   :  { %236 = vmatprep.subr.bf16.mxu0 %v261_v3 }
  0x36   :  { %237 = vmatpush3.bf16.msra.mxu0 %v261_v3 }
  0x37   :  { %238 = vmatprep.subr.bf16.mxu0 %v262_v7 }
  0x3a   :  { %239 = vmatpush3.bf16.msra.mxu0 %v262_v7 }
  0x3b   :  { %240 = vmatprep.subr.bf16.mxu0 %v263_v8 }
  0x3e   :  { %241 = vmatpush3.bf16.msra.mxu0 %v263_v8 }
  0x3f   :  { %242 = vmatprep.subr.bf16.mxu0 %v264_v9 }
  0x42   :  { %243 = vmatpush3.bf16.msra.mxu0 %v264_v9 }
  0x43   :  { %244 = vmatprep.subr.bf16.mxu0 %v265_v10 }
  0x46   :  { %245 = vmatpush3.bf16.msra.mxu0 %v265_v10 }
  0x49   :  { %247 = vmatmul.mubr.bf16.vlgmr.msra.gmra.mxu0 %v64_v12 }
 0x109   :  { %v248_v14 = vpop.f32.mrf.mxu0 }
 0x10a   :  { %v179_v16 = vadd.f32 %v248_v14, %v211_v13 }
 0x10b   :  { %v170_v17 = vpop.f32.mrf.mxu0 }
 0x10c   :  { %v189_v19 = vadd.f32 %v186_v15, %v179_v16  ;;  %v171_v20 = vadd.f32 %v211_v13, %v170_v17 }
 0x10d   :  { %v249_v21 = vpop.f32.mrf.mxu0 }
 0x10e   :  { %192 = vst [vmem:[#allocation8 + $0x10] sm:$0xff] %v189_v19  ;;  %v187_v22 = vadd.f32 %v184_v18, %v171_v20 }
 0x10f   :  { %v173_v23 = vpop.f32.mrf.mxu0 }
 0x110   :  { %190 = vst [vmem:[#allocation8] sm:$0xff] %v187_v22  ;;  %v174_v25 = vadd.f32 %v211_v13, %v173_v23 }
 0x112   :  { %v188_v26 = vadd.f32 %v185_v24, %v174_v25 }
 0x114   :  { %191 = vst [vmem:[#allocation8 + $0x8] sm:$0xff] %v188_v26 }
 0x115   :  { %337 = shalt.err (!%p334_p5)
}
 0x116   :  { %204 = dma.vmem_to_hbm [thread:$0]  %s199_s8, 384, %s413_s4, [#allocation4], %s356_s25, %s356_s25, %s357_s26  }
 0x117   :  { %350 = dma.done.wait [#allocation4], 384  }
 0x118   :  { %351 = vsyncadd [#allocation4], 4294966912 }
 0x119   :  { %208 = vsyncpa [#allocation3], 1 }
 0x11a   :  { %209 = vsyncpa [#allocation6], 1 }
 0x11b   :  { %210 = vsyncpa [#allocation4], 1 }

</bundles_post_ra>
